<compile_context>
chip_gen: v5e
topology: v5e:2x2
jax: 0.10.0
libtpu: 0.0.40
codegen_flags: <defaults>
</compile_context>

<pallas_src>
import functools

import jax
import jax.numpy as jnp
from jax.experimental import pallas as pl
from jax.experimental.pallas import tpu as pltpu

LANE = 128        # TPU lane width; all layer output dims are padded to this.
NEG_BIG = -1e30   # finite "minus infinity" for masked softmax lanes


def _round_up(n, m):
    return ((n + m - 1) // m) * m


# ---------------------------------------------------------------------------
# Host-side parameter packing (done once, like a weight-layout conversion).
# ---------------------------------------------------------------------------
def pack_params(w1, b1, w2, b2, w3, b3):
    """Pack weights into one (R, 128) bf16 slab and biases into one (3, 128)
    f32 slab.  Weights are (in_features, out_features); biases are (1, out).

    Padded weight columns/rows are zero, so padded activation lanes stay
    exactly 0 through the ReLU layers.  The padded lanes of the b3 bias row
    are set to -1e30 so the final softmax masks them with no extra kernel ops.
    Row offsets are multiples of 16 so bf16 sub-slices stay tile-aligned.
    """
    in_size, h1 = w1.shape
    _, h2 = w2.shape
    _, out_size = w3.shape
    assert w2.shape[0] == h1 and w3.shape[0] == h2

    off2 = _round_up(in_size, 16)      # w2 starts here (bf16 tile aligned)
    off3 = off2 + LANE                 # w3 starts here
    total_rows = off3 + LANE

    wbuf = jnp.zeros((total_rows, LANE), jnp.float32)
    wbuf = wbuf.at[0:in_size, 0:h1].set(w1)
    wbuf = wbuf.at[off2:off2 + h1, 0:h2].set(w2)
    wbuf = wbuf.at[off3:off3 + h2, 0:out_size].set(w3)
    wbuf = wbuf.astype(jnp.bfloat16)   # MXU-native operand dtype

    bbuf = jnp.zeros((3, LANE), jnp.float32)
    bbuf = bbuf.at[0, 0:h1].set(b1.reshape(-1))
    bbuf = bbuf.at[1, 0:h2].set(b2.reshape(-1))
    # Row 2 doubles as the softmax lane mask: padded lanes get a huge negative
    # bias, so exp(logit - max) underflows to exactly 0 there.
    b3_row = jnp.full((LANE,), NEG_BIG, jnp.float32)
    b3_row = b3_row.at[0:out_size].set(b3.reshape(-1))
    bbuf = bbuf.at[2, :].set(b3_row)

    meta = dict(in_size=in_size, h1=h1, h2=h2, out=out_size,
                off2=off2, off3=off3)
    return wbuf, bbuf, meta


# ---------------------------------------------------------------------------
# Kernel: fused fc1 -> ReLU -> fc2 -> ReLU -> fc3 -> softmax for one batch tile.
# ---------------------------------------------------------------------------
def _make_kernel(meta):
    in_size = meta["in_size"]
    out_size = meta["out"]
    off2 = meta["off2"]
    off3 = meta["off3"]

    def kernel(x_ref, w_ref, b_ref, o_ref):
        # bf16 operands to the MXU, f32 accumulation + f32 elementwise.
        xb = x_ref[...].astype(jnp.bfloat16)            # (tb, in_size)

        w1 = w_ref[0:in_size, :]                        # (in_size, 128) bf16
        w2 = w_ref[off2:off2 + LANE, :]                 # (128, 128)     bf16
        w3 = w_ref[off3:off3 + LANE, :]                 # (128, 128)     bf16
        b1 = b_ref[0:1, :]                              # (1, 128) f32
        b2 = b_ref[1:2, :]
        b3 = b_ref[2:3, :]                              # padded lanes = -1e30

        # fc1 + ReLU (padded lanes: 0*w + 0 bias -> relu(0) = 0)
        h1 = jnp.dot(xb, w1, preferred_element_type=jnp.float32)
        h1 = jnp.maximum(h1 + b1, 0.0)

        # fc2 + ReLU
        h2 = jnp.dot(h1.astype(jnp.bfloat16), w2,
                     preferred_element_type=jnp.float32)
        h2 = jnp.maximum(h2 + b2, 0.0)

        # fc3 (+ lane mask, carried by b3's padded lanes)
        logits = jnp.dot(h2.astype(jnp.bfloat16), w3,
                         preferred_element_type=jnp.float32)
        logits = logits + b3                            # (tb, 128) f32

        # Numerically stable softmax over dim=1 (matches nn.Softmax(dim=1)).
        m = jnp.max(logits, axis=-1, keepdims=True)
        e = jnp.exp(logits - m)                         # masked lanes -> 0
        denom = jnp.sum(e, axis=-1, keepdims=True)
        probs = e * pl.reciprocal(denom, approx=True)

        # Narrow store: only the real output lanes ever hit HBM.
        o_ref[...] = probs[:, 0:out_size].astype(o_ref.dtype)

    return kernel


# ---------------------------------------------------------------------------
# Wrapper: batch-tiled grid, resident weights, narrow output.
# ---------------------------------------------------------------------------
@functools.partial(jax.jit, static_argnames=("meta_key", "tile_b"))
def _forward_impl(x, weights, biases, meta_key, tile_b):
    meta = dict(meta_key)
    batch, in_size = x.shape
    out_size = meta["out"]
    grid = (batch // tile_b,)   # batch is pre-padded to a multiple of tile_b

    return pl.pallas_call(
        _make_kernel(meta),
        out_shape=jax.ShapeDtypeStruct((batch, out_size), jnp.float32),
        grid_spec=pltpu.PrefetchScalarGridSpec(
            num_scalar_prefetch=0,
            grid=grid,
            in_specs=[
                # activation stream: one batch tile per grid step
                pl.BlockSpec((tile_b, in_size), lambda i: (i, 0)),
                # packed weights / biases: VMEM-resident across the grid
                pl.BlockSpec(weights.shape, lambda i: (0, 0)),
                pl.BlockSpec(biases.shape, lambda i: (0, 0)),
            ],
            out_specs=pl.BlockSpec((tile_b, out_size), lambda i: (i, 0)),
        ),
        compiler_params=pltpu.CompilerParams(
            dimension_semantics=("parallel",)),
    )(x, weights, biases)


def neural_net_forward(x, weights, biases, meta, tile_b=None):
    """x: (B, input_size) f32; weights/biases/meta from pack_params."""
    batch = x.shape[0]
    if tile_b is None:
        if batch < 16:
            # Too small to split; one tile, rounded to the sublane multiple.
            tile_b = _round_up(max(batch, 8), 8)
        else:
            # Large tiles amortize per-step overhead and MXU weight pushes;
            # <= ceil(batch/2) keeps >= 2 grid steps (v7x megacore engages);
            # capped at 1024 rows so f32 intermediates fit v5e's 16 MiB
            # scoped-VMEM default (and v7x's smaller 64 MiB physical VMEM).
            tile_b = min(1024, _round_up(pl.cdiv(batch, 2), 8))
    tile_b = max(8, _round_up(tile_b, 8))

    # Pad ragged batches up to a multiple of the tile instead of collapsing
    # the grid to a single giant block; padded rows are zeros (finite math)
    # and are sliced off below.
    padded = _round_up(batch, tile_b)
    xp = jnp.pad(x, ((0, padded - batch), (0, 0))) if padded != batch else x

    meta_key = tuple(sorted(meta.items()))
    out = _forward_impl(xp, weights, biases, meta_key, tile_b)
    return out[:batch] if padded != batch else out


# ---------------------------------------------------------------------------
# Deterministic init mimicking torch.nn.Linear default (uniform +/- 1/sqrt(in)).
# Weight returned in (in, out) layout (PyTorch weight transposed); bias (1, out).
# ---------------------------------------------------------------------------
def init_linear(key, in_features, out_features):
    kw, kb = jax.random.split(key)
    bound = 1.0 / jnp.sqrt(jnp.float32(in_features))
    w = jax.random.uniform(kw, (in_features, out_features), jnp.float32,
                           -bound, bound)
    b = jax.random.uniform(kb, (1, out_features), jnp.float32, -bound, bound)
    return w, b


if __name__ == "__main__":
    input_size, hidden_size, output_size = 16, 32, 8

    key = jax.random.PRNGKey(0)
    kx, k1, k2, k3 = jax.random.split(key, 4)

    w1, b1 = init_linear(k1, input_size, hidden_size)
    w2, b2 = init_linear(k2, hidden_size, hidden_size // 2)
    w3, b3 = init_linear(k3, hidden_size // 2, output_size)

    weights, biases, meta = pack_params(w1, b1, w2, b2, w3, b3)

    def ref_forward(x):
        h1 = jnp.maximum(x @ w1 + b1, 0.0)
        h2 = jnp.maximum(h1 @ w2 + b2, 0.0)
        return jax.nn.softmax(h2 @ w3 + b3, axis=1)

    # batch=8 hits the exact-tile path; batch=12 exercises pad-to-tile + slice.
    for batch in (8, 12):
        x = jax.random.normal(jax.random.fold_in(kx, batch),
                              (batch, input_size), jnp.float32)
        out = jax.block_until_ready(
            neural_net_forward(x, weights, biases, meta))
        ref = ref_forward(x)

        assert out.shape == (batch, output_size)
        # Tolerance accounts for bf16 MXU operands + approx reciprocal.
        assert jnp.allclose(out, ref, atol=2e-2, rtol=2e-2), \
            f"batch={batch}: max abs err = {jnp.max(jnp.abs(out - ref))}"
        assert jnp.allclose(jnp.sum(out, axis=1), 1.0, atol=1e-2)

    print("KERNEL_OK")
</pallas_src>

<mosaic_0001>
module attributes {stable_mosaic.version = 11 : i64} {
  func.func @kernel(%arg0: i32, %arg1: memref<8x16xf32, #tpu.memory_space<vmem>>, %arg2: memref<272x128xbf16, #tpu.memory_space<vmem>>, %arg3: memref<3x128xf32, #tpu.memory_space<vmem>>, %arg4: memref<8x8xf32, #tpu.memory_space<vmem>>) attributes {dimension_semantics = [#tpu.dimension_semantics<parallel>], iteration_bounds = array<i64: 1>, scalar_prefetch = 0 : i64, scratch_operands = 0 : i64, tpu.core_type = #tpu.core_type<tc>, window_params = [{transform_indices = @transform_0, window_bounds = array<i64: 8, 16>}, {pipeline_mode = #tpu.pipeline_mode<synchronous>, transform_indices = @transform_1, window_bounds = array<i64: 272, 128>}, {pipeline_mode = #tpu.pipeline_mode<synchronous>, transform_indices = @transform_2, window_bounds = array<i64: 3, 128>}, {transform_indices = @transform_3, window_bounds = array<i64: 8, 8>}]} {
    %c0 = arith.constant 0 : index
    %c0_0 = arith.constant 0 : index
    %0 = vector.load %arg1[%c0, %c0_0] : memref<8x16xf32, #tpu.memory_space<vmem>>, vector<8x16xf32>
    %1 = arith.truncf %0 : vector<8x16xf32> to vector<8x16xbf16>
    %c0_1 = arith.constant 0 : index
    %c0_2 = arith.constant 0 : index
    %2 = vector.load %arg2[%c0_1, %c0_2] : memref<272x128xbf16, #tpu.memory_space<vmem>>, vector<16x128xbf16>
    %c16 = arith.constant 16 : index
    %c0_3 = arith.constant 0 : index
    %3 = vector.load %arg2[%c16, %c0_3] : memref<272x128xbf16, #tpu.memory_space<vmem>>, vector<128x128xbf16>
    %c144 = arith.constant 144 : index
    %c0_4 = arith.constant 0 : index
    %4 = vector.load %arg2[%c144, %c0_4] : memref<272x128xbf16, #tpu.memory_space<vmem>>, vector<128x128xbf16>
    %c0_5 = arith.constant 0 : index
    %c0_6 = arith.constant 0 : index
    %5 = vector.load %arg3[%c0_5, %c0_6] : memref<3x128xf32, #tpu.memory_space<vmem>>, vector<1x128xf32>
    %c1 = arith.constant 1 : index
    %c0_7 = arith.constant 0 : index
    %6 = vector.load %arg3[%c1, %c0_7] : memref<3x128xf32, #tpu.memory_space<vmem>>, vector<1x128xf32>
    %c2 = arith.constant 2 : index
    %c0_8 = arith.constant 0 : index
    %7 = vector.load %arg3[%c2, %c0_8] : memref<3x128xf32, #tpu.memory_space<vmem>>, vector<1x128xf32>
    %cst = arith.constant dense<0.000000e+00> : vector<8x128xf32>
    %8 = tpu.matmul %1, %2, %cst {dimension_numbers = #tpu.dot_dimension_numbers<[1], [0], [0], [1], [0, 0, 1, 1], [], []>} : vector<8x16xbf16>, vector<16x128xbf16>, vector<8x128xf32> -> vector<8x128xf32>
    %9 = vector.broadcast %5 : vector<1x128xf32> to vector<8x128xf32>
    %10 = arith.addf %8, %9 : vector<8x128xf32>
    %cst_9 = arith.constant 0.000000e+00 : f32
    %11 = vector.broadcast %cst_9 : f32 to vector<8x128xf32>
    %12 = arith.maximumf %10, %11 : vector<8x128xf32>
    %13 = arith.truncf %12 : vector<8x128xf32> to vector<8x128xbf16>
    %cst_10 = arith.constant dense<0.000000e+00> : vector<8x128xf32>
    %14 = tpu.matmul %13, %3, %cst_10 {dimension_numbers = #tpu.dot_dimension_numbers<[1], [0], [0], [1], [0, 0, 1, 1], [], []>} : vector<8x128xbf16>, vector<128x128xbf16>, vector<8x128xf32> -> vector<8x128xf32>
    %15 = vector.broadcast %6 : vector<1x128xf32> to vector<8x128xf32>
    %16 = arith.addf %14, %15 : vector<8x128xf32>
    %cst_11 = arith.constant 0.000000e+00 : f32
    %17 = vector.broadcast %cst_11 : f32 to vector<8x128xf32>
    %18 = arith.maximumf %16, %17 : vector<8x128xf32>
    %19 = arith.truncf %18 : vector<8x128xf32> to vector<8x128xbf16>
    %cst_12 = arith.constant dense<0.000000e+00> : vector<8x128xf32>
    %20 = tpu.matmul %19, %4, %cst_12 {dimension_numbers = #tpu.dot_dimension_numbers<[1], [0], [0], [1], [0, 0, 1, 1], [], []>} : vector<8x128xbf16>, vector<128x128xbf16>, vector<8x128xf32> -> vector<8x128xf32>
    %21 = vector.broadcast %7 : vector<1x128xf32> to vector<8x128xf32>
    %22 = arith.addf %20, %21 : vector<8x128xf32>
    %cst_13 = arith.constant dense<0xFF800000> : vector<8xf32>
    %23 = vector.multi_reduction <maximumf>, %22, %cst_13 [1] : vector<8x128xf32> to vector<8xf32>
    %24 = vector.shape_cast %23 : vector<8xf32> to vector<8x1xf32>
    %25 = vector.broadcast %24 : vector<8x1xf32> to vector<8x128xf32>
    %26 = arith.subf %22, %25 : vector<8x128xf32>
    %27 = math.exp %26 : vector<8x128xf32>
    %cst_14 = arith.constant dense<0.000000e+00> : vector<8xf32>
    %28 = vector.multi_reduction <add>, %27, %cst_14 [1] : vector<8x128xf32> to vector<8xf32>
    %29 = vector.shape_cast %28 : vector<8xf32> to vector<8x1xf32>
    %30 = tpu.reciprocal %29 {approx = true} : vector<8x1xf32> -> vector<8x1xf32>
    %31 = vector.broadcast %30 : vector<8x1xf32> to vector<8x128xf32>
    %32 = arith.mulf %27, %31 : vector<8x128xf32>
    %33 = vector.extract_strided_slice %32 {offsets = [0, 0], sizes = [8, 8], strides = [1, 1]} : vector<8x128xf32> to vector<8x8xf32>
    %c0_15 = arith.constant 0 : index
    %c0_16 = arith.constant 0 : index
    %34 = vector.load %arg4[%c0_15, %c0_16] : memref<8x8xf32, #tpu.memory_space<vmem>>, vector<8x8xf32>
    tpu.vector_store %arg4[%c0_15, %c0_16], %33 {strides = array<i32>} : memref<8x8xf32, #tpu.memory_space<vmem>>, vector<8x8xf32>,
    return
  }
  func.func @transform_0(%arg0: i32) -> (i32, i32) {
    %c0_i32 = arith.constant 0 : i32
    %c0_i32_0 = arith.constant 0 : i32
    return %arg0, %c0_i32 : i32, i32
  }
  func.func @transform_1(%arg0: i32) -> (i32, i32) {
    %c0_i32 = arith.constant 0 : i32
    %c0_i32_0 = arith.constant 0 : i32
    %c0_i32_1 = arith.constant 0 : i32
    return %c0_i32, %c0_i32_0 : i32, i32
  }
  func.func @transform_2(%arg0: i32) -> (i32, i32) {
    %c0_i32 = arith.constant 0 : i32
    %c0_i32_0 = arith.constant 0 : i32
    %c0_i32_1 = arith.constant 0 : i32
    return %c0_i32, %c0_i32_0 : i32, i32
  }
  func.func @transform_3(%arg0: i32) -> (i32, i32) {
    %c0_i32 = arith.constant 0 : i32
    %c0_i32_0 = arith.constant 0 : i32
    return %arg0, %c0_i32 : i32, i32
  }
}

</mosaic_0001>

<bundles_post_ra>
// kernel: _forward_impl.1
= control target key start
LH: loop header
LB: loop body
LE: loop exit
PB: predicated region body
PF: predicated region fallthrough
CT: control target
= control target key end

     0   :  { %8 = vsyncpa [#allocation3], 0  ;;  %s518_s0 = inlined_call_operand.hbm [shape: f32[8,16], index: 0, kind: input, shape index: {}]   ;;  %s519_s1 = inlined_call_operand.hbm [shape: bf16[272,128], index: 1, kind: input, shape index: {}]   ;;  %s520_s2 = inlined_call_operand.hbm [shape: f32[3,128], index: 2, kind: input, shape index: {}]   ;;  %s521_s3 = inlined_call_operand.hbm [shape: f32[8,8], index: 3, kind: output, shape index: {}]  }
   0x1   :  { %9 = vsyncpa [#allocation6], 0  ;;  %s26_s14 = sshll.u32 %s519_s1, 4  ;;  %s27_s14 = int_to_ptr.hbm [resolvable:$true] %s26_s14 }
   0x2   :  { %10 = vsyncpa [#allocation4], 0  ;;  %s480_s15 = smov [#allocation5]   ;;  %s16_s19 = sshll.u32 %s518_s0, 4  ;;  %s17_s19 = int_to_ptr.hbm [resolvable:$true] %s16_s19 }
   0x3   :  { %s28_s16 = sshll.u32 %s480_s15, 4  ;;  %s481_s20 = smov 64   ;;  %s29_s16 = int_to_ptr.vmem [resolvable:$true] %s28_s16 }
   0x4   :  { %s482_s21 = smov 4   ;;  %s483_s22 = smov [#allocation2]  }
   0x5   :  { %34 = dma.hbm_to_vmem [thread:$0]  %s27_s14, 2176, %s29_s16, [#allocation6], %s481_s20, %s481_s20, %s482_s21  }
   0x6   :  { %s18_s23 = sshll.u32 %s483_s22, 4  ;;  %s40_s26 = sshll.u32 %s520_s2, 4  ;;  %s19_s23 = int_to_ptr.vmem [resolvable:$true] %s18_s23  ;;  %s41_s26 = int_to_ptr.hbm [resolvable:$true] %s40_s26 }
   0x7   :  { %21 = dma.hbm_to_vmem [thread:$0]  %s17_s19, 128, %s19_s23, [#allocation3]  }
   0x8   :  { %s484_s1 = smov [#allocation7]  }
   0x9   :  { %s42_s27 = sshll.u32 %s484_s1, 4  ;;  %s43_s27 = int_to_ptr.vmem [resolvable:$true] %s42_s27 }
   0xa   :  { %45 = dma.hbm_to_vmem [thread:$0]  %s41_s26, 64, %s43_s27, [#allocation6]  }
   0xb   :  { %474 = dma.done.wait [#allocation3], 128  }
   0xc   :  { %475 = vsyncadd [#allocation3], 4294967168 }
   0xd   :  { %476 = dma.done.wait [#allocation6], 2240  }
   0xe   :  { %477 = vsyncadd [#allocation6], 4294965056  ;;  %v348_v0 = vld [vmem:[#allocation5] sm:$0xff]  ;;  %v59_v1 = vld [vmem:[#allocation2] sm:$0xff]  ;;  %vm105_vm0 = vcmask 130048   ;;  %s485_s0 = smov [#allocation8]  }
   0xf   :  { %v356_v2 = vld [vmem:[#allocation5 + $0x40] sm:$0xff]  ;;  %v60_v3 = vpack.c.bf16 %v59_v1, %v59_v1  ;;  %116 = vmatpush.bf16.msra.mxu0 %v348_v0  ;;  %v355_v4 = vld [vmem:[#allocation5 + $0x38] sm:$0xff]  ;;  %v354_v5 = vld [vmem:[#allocation5 + $0x30] sm:$0xff]  ;;  %s266_s2 = sshll.u32 %s485_s0, 4  ;;  %s268_s30 = sshll.u32 %s521_s3, 4  ;;  %vm259_vm1 = vcmask 64512   ;;  %s267_s2 = int_to_ptr.vmem [resolvable:$true] %s266_s2  ;;  %s269_s30 = int_to_ptr.hbm [resolvable:$true] %s268_s30 }
  0x10   :  { %173 = vmatpush.bf16.msra.mxu1 %v356_v2  ;;  %v353_v6 = vld [vmem:[#allocation5 + $0x28] sm:$0xff]  ;;  %v352_v7 = vld [vmem:[#allocation5 + $0x20] sm:$0xff]  ;;  %v351_v8 = vld [vmem:[#allocation5 + $0x18] sm:$0xff] }
  0x11   :  { %v350_v9 = vld [vmem:[#allocation5 + $0x10] sm:$0xff]  ;;  %v349_v10 = vld [vmem:[#allocation5 + $0x8] sm:$0xff]  ;;  %v364_v11 = vld [vmem:[#allocation5 + $0x80] sm:$0xff] }
  0x12   :  { %283 = vmatmul.msk.bf16.vlgmr.msra.gmra.mxu0 %vm105_vm0, %v60_v3  ;;  %237 = vmatpush.bf16.msra.mxu2 %v364_v11  ;;  %v363_v12 = vld [vmem:[#allocation5 + $0x78] sm:$0xff]  ;;  %v362_v13 = vld [vmem:[#allocation5 + $0x70] sm:$0xff]  ;;  %v361_v14 = vld [vmem:[#allocation5 + $0x68] sm:$0xff] }
  0x13   :  { %v360_v15 = vld [vmem:[#allocation5 + $0x60] sm:$0xff]  ;;  %v359_v16 = vld [vmem:[#allocation5 + $0x58] sm:$0xff]  ;;  %v371_v17 = vld [vmem:[#allocation7] ss:$0 sm:$0xff] }
  0x14   :  { %174 = vmatpush.bf16.msra.mxu1 %v355_v4  ;;  %v358_v23 = vld [vmem:[#allocation5 + $0x50] sm:$0xff]  ;;  %v357_v24 = vld [vmem:[#allocation5 + $0x48] sm:$0xff] }
  0x15   :  { %v372_v25 = vld [vmem:[#allocation7 + $0x1] ss:$0 sm:$0xff]  ;;  %v373_v31 = vld [vmem:[#allocation7 + $0x2] ss:$0 sm:$0xff] }
  0x16   :  { %238 = vmatpush.bf16.msra.mxu2 %v363_v12 }
  0x18   :  { %175 = vmatpush.bf16.msra.mxu1 %v354_v5 }
  0x1a   :  { %239 = vmatpush.bf16.msra.mxu2 %v362_v13 }
  0x1c   :  { %176 = vmatpush.bf16.msra.mxu1 %v353_v6 }
  0x1e   :  { %240 = vmatpush.bf16.msra.mxu2 %v361_v14 }
  0x20   :  { %177 = vmatpush.bf16.msra.mxu1 %v352_v7 }
  0x22   :  { %241 = vmatpush.bf16.msra.mxu2 %v360_v15 }
  0x24   :  { %178 = vmatpush.bf16.msra.mxu1 %v351_v8 }
  0x26   :  { %242 = vmatpush.bf16.msra.mxu2 %v359_v16 }
  0x28   :  { %179 = vmatpush.bf16.msra.mxu1 %v350_v9 }
  0x2a   :  { %243 = vmatpush.bf16.msra.mxu2 %v358_v23 }
  0x2c   :  { %180 = vmatpush.bf16.msra.mxu1 %v349_v10 }
  0x2e   :  { %244 = vmatpush.bf16.msra.mxu2 %v357_v24 }
  0x8f   :  { %v118_v18 = vpop.f32.mrf.mxu0 }
  0x90   :  { %v119_v19 = vadd.f32 %v371_v17, %v118_v18 }
  0x92   :  { %v122_v20 = vmax.f32 %v119_v19, 0.0 }
  0x94   :  { %v123_v21 = vpack.c.bf16 %v122_v20, %v122_v20 }
  0x96   :  { %181 = vmatmul.bf16.vlgmr.msra.gmra.mxu1 %v123_v21 }
  0x97   :  { %v120_v22 = vpop.f32.mrf.mxu0 }
 0x113   :  { %v182_v26 = vpop.f32.mrf.mxu1 }
 0x114   :  { %v183_v27 = vadd.f32 %v372_v25, %v182_v26 }
 0x116   :  { %v186_v28 = vmax.f32 %v183_v27, 0.0 }
 0x118   :  { %v187_v29 = vpack.c.bf16 %v186_v28, %v186_v28 }
 0x11a   :  { %245 = vmatmul.bf16.vlgmr.msra.gmra.mxu2 %v187_v29 }
 0x11b   :  { %v184_v30 = vpop.f32.mrf.mxu1 }
 0x19d   :  { %v246_v32 = vpop.f32.mrf.mxu2 }
 0x19e   :  { %v247_v33 = vadd.f32 %v373_v31, %v246_v32 }
 0x1a0   :  { %250 = vmax.xlane.f32.xlu0 %v247_v33 }
 0x1a5   :  { %v248_v34 = vpop.f32.mrf.mxu2 }
 0x213   :  { %v251_v35 = vpop.xlane.xlu0 %250 }
 0x214   :  { %v252_v36 = vsub.f32 %v247_v33, %v251_v35 }
 0x216   :  { %v253_v37 = vmul.f32 1.442695, %v252_v36 }
 0x218   :  { %374 = vpow2.f32 %v253_v37 }
 0x21e   :  { %v375_v38 = vpop.eup %374 }
 0x21f   :  { %255 = vadd.xlane.f32.xlu0 %v375_v38 }
 0x292   :  { %v256_v39 = vpop.xlane.xlu0 %255 }
 0x293   :  { %376 = vrcp.f32 %v256_v39 }
 0x299   :  { %v377_v40 = vpop.eup %376 }
 0x29a   :  { %v258_v41 = vmul.f32 %v377_v40, %v375_v38 }
 0x29c   :  { %260 = vst.msk [vmem:[#allocation8] sm:$0xff] %vm259_vm1, %v258_v41 }
 0x29d   :  { %271 = dma.vmem_to_hbm [thread:$0]  %s267_s2, 128, %s269_s30, [#allocation4]  }
 0x29e   :  { %478 = dma.done.wait [#allocation4], 128  }
 0x29f   :  { %479 = vsyncadd [#allocation4], 4294967168 }
 0x2a0   :  { %276 = vsyncpa [#allocation3], 1 }
 0x2a1   :  { %277 = vsyncpa [#allocation6], 1 }
 0x2a2   :  { %278 = vsyncpa [#allocation4], 1 }

</bundles_post_ra>
